<compile_context>
chip_gen: v7x
topology: tpu7x:2x2x1
jax: 0.10.0
libtpu: 0.0.40
codegen_flags: <defaults>
</compile_context>

<pallas_src>
import jax
import jax.numpy as jnp
from jax.experimental import pallas as pl
from jax.experimental.pallas import tpu as pltpu

EPS = 1e-10


def _l1norm_kernel_packed(seg_ref, x_ref, o_ref):
    """K descriptors packed per 128-lane row; segmented L1 sum via MXU matmul."""
    x = x_ref[...].astype(jnp.float32)                       # f32 compute
    ax = jnp.abs(x)
    norm = jnp.dot(ax, seg_ref[...],
                   preferred_element_type=jnp.float32,
                   precision=jax.lax.Precision.HIGHEST) + EPS
    inv = pl.reciprocal(norm, approx=True)                   # EUP slot
    inv = inv * (2.0 - norm * inv)                           # Newton -> ~f32 exact
    o_ref[...] = (x * inv).astype(o_ref.dtype)


def _l1norm_kernel_rowwise(x_ref, o_ref):
    """One descriptor per row: lane-axis reduce (XLU) + lane broadcast."""
    x = x_ref[...].astype(jnp.float32)
    norm = jnp.sum(jnp.abs(x), axis=1, keepdims=True) + EPS  # (br, 1)
    inv = pl.reciprocal(norm, approx=True)
    inv = inv * (2.0 - norm * inv)
    o_ref[...] = (x * inv).astype(o_ref.dtype)


def l1norm(x: jax.Array, *, block_rows=None, min_grid_steps: int = 8) -> jax.Array:
    """Row-wise L1 normalization of an (N, D) array (HardNet L1Norm)."""
    n, d = x.shape
    orig_dtype = x.dtype
    itemsize = jnp.dtype(x.dtype).itemsize

    # ---- lane layout: keep the output lane-dense (multiple of 128) --------
    lane_pad = 0
    if d < 128 and 128 % d == 0:
        k = 128 // d                      # pack K descriptors per 128-lane row
        d_work = d
    else:
        k = 1
        d_work = pl.cdiv(d, 128) * 128    # zero-pad lanes; |0| adds nothing
        lane_pad = d_work - d
        if lane_pad:
            x = jnp.pad(x, ((0, 0), (0, lane_pad)))
    pd = k * d_work

    # ---- row layout: only pad when N is not a multiple of K ---------------
    row_pad = (-n) % k
    if row_pad:
        x = jnp.pad(x, ((0, row_pad), (0, 0)))
    n_work = n + row_pad
    r = n_work // k
    xp = x.reshape(r, pd)                 # contiguous -> free reshape

    # ---- block sizing ------------------------------------------------------
    sub_align = 8 * max(1, 4 // itemsize)            # 8 f32 / 16 bf16 / 32 i8
    # Cap the per-block f32 working set at ~4 MiB (block + in-kernel f32
    # temporaries stay well under 48 MiB vmem_limit on every generation).
    max_block_f32_elems = 1 << 20                    # 1M elems = 4 MiB f32
    br_cap = max(sub_align,
                 (max_block_f32_elems // pd) // sub_align * sub_align)
    # Aim for >= min_grid_steps grid steps so the "parallel" row axis feeds
    # both v7x TensorCores and the pipeline has steps to hide DMA behind.
    br_target = pl.cdiv(pl.cdiv(r, min_grid_steps), sub_align) * sub_align
    br = min(br_cap, max(sub_align, br_target))
    if block_rows is not None:
        br = min(br, max(sub_align, (block_rows // sub_align) * sub_align))
    br = min(br, pl.cdiv(r, sub_align) * sub_align)  # don't exceed (aligned) rows
    br = max(sub_align, br)
    grid = (pl.cdiv(r, br),)              # ragged last block handled by Pallas

    # ---- specs / constant segmented-sum matrix -----------------------------
    out_spec = pl.BlockSpec((br, pd), lambda i: (i, 0))
    if k > 1:
        idx = jnp.arange(pd, dtype=jnp.int32) // d_work
        seg = (idx[:, None] == idx[None, :]).astype(jnp.float32)   # (pd, pd)
        kernel = _l1norm_kernel_packed
        in_specs = [pl.BlockSpec((pd, pd), lambda i: (0, 0)),      # resident
                    pl.BlockSpec((br, pd), lambda i: (i, 0))]
        args = (seg, xp)
        matmul_flops = 2 * r * pd * pd
    else:
        kernel = _l1norm_kernel_rowwise
        in_specs = [pl.BlockSpec((br, pd), lambda i: (i, 0))]
        args = (xp,)
        matmul_flops = r * pd

    cost = pl.CostEstimate(
        flops=int(6 * r * pd + matmul_flops),
        transcendentals=int(r * pd),
        bytes_accessed=int(2 * r * pd * itemsize),
    )

    out = pl.pallas_call(
        kernel,
        out_shape=jax.ShapeDtypeStruct((r, pd), orig_dtype),
        grid_spec=pltpu.PrefetchScalarGridSpec(
            num_scalar_prefetch=0,
            grid=grid,
            in_specs=in_specs,
            out_specs=out_spec,
        ),
        compiler_params=pltpu.CompilerParams(
            dimension_semantics=("parallel",),        # megacore rows on v7x
            vmem_limit_bytes=48 * 1024 * 1024,        # < v7x 64 MiB physical
        ),
        cost_estimate=cost,
    )(*args)

    out = out.reshape(n_work, d_work)
    if row_pad:
        out = out[:n]
    if lane_pad:
        out = out[:, :d]
    return out


if __name__ == "__main__":
    def ref_l1norm(x):
        xf = x.astype(jnp.float32)
        return (xf / (jnp.sum(jnp.abs(xf), axis=1, keepdims=True) + EPS)
                ).astype(x.dtype)

    key = jax.random.PRNGKey(0)
    cases = [
        ((8, 32), jnp.float32),      # packed: K=4 descriptors per 128-lane row
        ((7, 32), jnp.float32),      # packed + N % K != 0 (row-pad path)
        ((24, 128), jnp.float32),    # native 128-wide HardNet descriptors
        ((10, 96), jnp.float32),     # lane-pad path (96 -> 128 zero columns)
        ((1000, 128), jnp.float32),  # multi-step grid + ragged last block
        ((16, 128), jnp.bfloat16),   # low-precision storage path
    ]
    for shape, dtype in cases:
        key, sub = jax.random.split(key)
        x = jax.random.normal(sub, shape, dtype=jnp.float32).astype(dtype)
        out = jax.block_until_ready(l1norm(x))
        ref = ref_l1norm(x)
        assert out.shape == x.shape and out.dtype == x.dtype, (shape, dtype)
        tol = 2e-2 if dtype == jnp.bfloat16 else 2e-5
        assert jnp.allclose(out.astype(jnp.float32), ref.astype(jnp.float32),
                            atol=tol, rtol=10 * tol), (shape, dtype)

    print("KERNEL_OK")
</pallas_src>

<mosaic_0001>
module attributes {stable_mosaic.version = 11 : i64} {
  func.func @_l1norm_kernel_packed(%arg0: i32, %arg1: memref<128x128xf32, #tpu.memory_space<vmem>>, %arg2: memref<8x128xf32, #tpu.memory_space<vmem>>, %arg3: memref<8x128xf32, #tpu.memory_space<vmem>>) attributes {dimension_semantics = [#tpu.dimension_semantics<parallel>], iteration_bounds = array<i64: 1>, scalar_prefetch = 0 : i64, scratch_operands = 0 : i64, tpu.core_type = #tpu.core_type<tc>, window_params = [{pipeline_mode = #tpu.pipeline_mode<synchronous>, transform_indices = @transform_0, window_bounds = array<i64: 128, 128>}, {transform_indices = @transform_1, window_bounds = array<i64: 8, 128>}, {transform_indices = @transform_2, window_bounds = array<i64: 8, 128>}]} {
    %c0 = arith.constant 0 : index
    %c0_0 = arith.constant 0 : index
    %0 = vector.load %arg2[%c0, %c0_0] : memref<8x128xf32, #tpu.memory_space<vmem>>, vector<8x128xf32>
    %1 = math.absf %0 : vector<8x128xf32>
    %c0_1 = arith.constant 0 : index
    %c0_2 = arith.constant 0 : index
    %2 = vector.load %arg1[%c0_1, %c0_2] : memref<128x128xf32, #tpu.memory_space<vmem>>, vector<128x128xf32>
    %cst = arith.constant dense<0.000000e+00> : vector<8x128xf32>
    %3 = tpu.matmul %1, %2, %cst {dimension_numbers = #tpu.dot_dimension_numbers<[1], [0], [0], [1], [0, 0, 1, 1], [], []>, precision = #tpu.contract_precision<fp32>} : vector<8x128xf32>, vector<128x128xf32>, vector<8x128xf32> -> vector<8x128xf32>
    %cst_3 = arith.constant 1.000000e-10 : f32
    %4 = vector.broadcast %cst_3 : f32 to vector<8x128xf32>
    %5 = arith.addf %3, %4 : vector<8x128xf32>
    %6 = tpu.reciprocal %5 {approx = true} : vector<8x128xf32> -> vector<8x128xf32>
    %7 = arith.mulf %5, %6 : vector<8x128xf32>
    %cst_4 = arith.constant 2.000000e+00 : f32
    %8 = vector.broadcast %cst_4 : f32 to vector<8x128xf32>
    %9 = arith.subf %8, %7 : vector<8x128xf32>
    %10 = arith.mulf %6, %9 : vector<8x128xf32>
    %11 = arith.mulf %0, %10 : vector<8x128xf32>
    %c0_5 = arith.constant 0 : index
    %c0_6 = arith.constant 0 : index
    %12 = vector.load %arg3[%c0_5, %c0_6] : memref<8x128xf32, #tpu.memory_space<vmem>>, vector<8x128xf32>
    tpu.vector_store %arg3[%c0_5, %c0_6], %11 {strides = array<i32>} : memref<8x128xf32, #tpu.memory_space<vmem>>, vector<8x128xf32>,
    return
  }
  func.func @transform_0(%arg0: i32) -> (i32, i32) {
    %c0_i32 = arith.constant 0 : i32
    %c0_i32_0 = arith.constant 0 : i32
    %c0_i32_1 = arith.constant 0 : i32
    return %c0_i32, %c0_i32_0 : i32, i32
  }
  func.func @transform_1(%arg0: i32) -> (i32, i32) {
    %c0_i32 = arith.constant 0 : i32
    %c0_i32_0 = arith.constant 0 : i32
    return %arg0, %c0_i32 : i32, i32
  }
  func.func @transform_2(%arg0: i32) -> (i32, i32) {
    %c0_i32 = arith.constant 0 : i32
    %c0_i32_0 = arith.constant 0 : i32
    return %arg0, %c0_i32 : i32, i32
  }
}

</mosaic_0001>

<bundles_post_ra>
// kernel: tpu_custom_call.1
= control target key start
LH: loop header
LB: loop body
LE: loop exit
PB: predicated region body
PF: predicated region fallthrough
CT: control target
= control target key end

     0   :  { %7 = vsyncpa [#allocation3], 0  ;;  %s1535_s0 = inlined_call_operand.hbm [shape: f32[128,128], index: 0, kind: input, shape index: {}]   ;;  %s1536_s1 = inlined_call_operand.vmem [shape: f32[2,128], index: 1, kind: input, shape index: {}]   ;;  %s1537_s2 = inlined_call_operand.hbm [shape: f32[2,128], index: 2, kind: output, shape index: {}]  }
   0x1   :  { %8 = vsyncpa [#allocation4], 0  ;;  %s1233_s9 = smov [#allocation2]   ;;  %s1185_s13 = scalar_lea.hbm %s1535_s0, 2048 }
   0x2   :  { %s14_s10 = sshll.u32 %s1233_s9, 4  ;;  %p1186_p0 = scmp.ne.s32.totalorder %s1535_s0, %s1185_s13  ;;  %s15_s10 = int_to_ptr.vmem [resolvable:$true] %s14_s10 }
   0x3   :  { %p1189_p1 = scmp.lt.u32.totalorder %s1185_s13, %s1535_s0 }
   0x5   :  { %p1191_p2 = pnand %p1189_p1, %p1186_p0 }
   0x7   :  { %1194 = shalt.err (!%p1191_p2)
}
   0x8   :  { %s1195_s18 = scalar_lea.vmem %s15_s10, 2048  ;;  %p1200_p4 = scmp.lt.s32.totalorder %s15_s10, %s15_s10 }
   0x9   :  { %p1196_p3 = scmp.ne.s32.totalorder %s15_s10, %s1195_s18  ;;  %p1201_p5 = scmp.lt.s32.totalorder %s1195_s18, %s1195_s18 }
   0xb   :  { %p1202_p6 = por %p1201_p5, %p1200_p4 }
   0xd   :  { %p1203_p7 = pnand %p1202_p6, %p1196_p3 }
   0xf   :  { %1206 = shalt.err (!%p1203_p7)
}
  0x10   :  { %s1234_s19 = smov 128   ;;  %s1235_s20 = smov 8  }
  0x11   :  { %20 = dma.hbm_to_vmem [thread:$0]  %s1535_s0, 2048, %s15_s10, [#allocation3], %s1234_s19, %s1234_s19, %s1235_s20  }
  0x12   :  { %1229 = dma.done.wait [#allocation3], 2048  }
  0x13   :  { %1230 = vsyncadd [#allocation3], 4294965248  ;;  %v1236_v0 = vmov 0.0|0.0   ;;  %vm1237_vm0 = vmmov 0   ;;  %v1238_v1 = vmov 0.0   ;;  %v28_v2 = vld [vmem:[#allocation2] sm:$0xff] }
  0x14   :  { %1020 = vmatprep.subr.bf16.mxu1 %v1236_v0  ;;  %1092 = vmatprep.subr.bf16.mxu0 %v1236_v0  ;;  %v29_v3 = vld [vmem:[#allocation2 + $0x8] sm:$0xff]  ;;  %v30_v4 = vld [vmem:[#allocation2 + $0x10] sm:$0xff]  ;;  %v45_v5 = vand.u32 4294901760, %v28_v2  ;;  %v31_v7 = vld [vmem:[#allocation2 + $0x18] sm:$0xff] }
  0x15   :  { %842 = vmatprep.mubr.msk.f32.mxu1 %vm1237_vm0, %v1238_v1  ;;  %947 = vmatprep.mubr.msk.f32.mxu0 %vm1237_vm0, %v1238_v1  ;;  %v48_v6 = vand.u32 4294901760, %v29_v3  ;;  %v51_v8 = vand.u32 4294901760, %v30_v4  ;;  %v54_v9 = vand.u32 4294901760, %v31_v7  ;;  %v32_v10 = vld [vmem:[#allocation2 + $0x20] sm:$0xff]  ;;  %v33_v11 = vld [vmem:[#allocation2 + $0x28] sm:$0xff]  ;;  %v34_v16 = vld [vmem:[#allocation2 + $0x30] sm:$0xff] }
  0x16   :  { %v57_v14 = vand.u32 4294901760, %v32_v10  ;;  %v60_v15 = vand.u32 4294901760, %v33_v11  ;;  %v35_v17 = vld [vmem:[#allocation2 + $0x38] sm:$0xff]  ;;  %v63_v19 = vand.u32 4294901760, %v34_v16  ;;  %v1290_v21 = vld [vmem:[%s1536_s1] sm:$0xff]  ;;  %v1296_v23 = vld [vmem:[#allocation2 + $0x48] sm:$0xff]  ;;  %v1311_v30 = vsub.f32 %v28_v2, %v45_v5 }
  0x17   :  { %v1275_v12 = vpack.c.bf16 %v48_v6, %v45_v5  ;;  %v1279_v13 = vpack.c.bf16 %v54_v9, %v51_v8  ;;  %v66_v20 = vand.u32 4294901760, %v35_v17  ;;  %v1294_v22 = vld [vmem:[#allocation2 + $0x40] sm:$0xff]  ;;  %v27_v24 = vand.u32 2147483647, %v1290_v21  ;;  %v1307_v28 = vld [vmem:[#allocation2 + $0x50] sm:$0xff]  ;;  %v1309_v29 = vld [vmem:[#allocation2 + $0x58] sm:$0xff] }
  0x18   :  { %v1285_v18 = vpack.c.bf16 %v60_v15, %v57_v14  ;;  %v69_v26 = vand.u32 4294901760, %v1294_v22  ;;  %v72_v27 = vand.u32 4294901760, %v1296_v23  ;;  %v1315_v32 = vsub.f32 %v29_v3, %v48_v6  ;;  %v1323_v36 = vld [vmem:[#allocation2 + $0x60] sm:$0xff]  ;;  %v1327_v37 = vld [vmem:[#allocation2 + $0x68] sm:$0xff]  ;;  %v1346_v44 = vld [vmem:[#allocation2 + $0x70] sm:$0xff] }
  0x19   :  { %1022 = vmatpush3.bf16.msra.mxu1 %v1275_v12  ;;  %1094 = vmatpush3.bf16.msra.mxu0 %v1275_v12  ;;  %v1301_v25 = vpack.c.bf16 %v66_v20, %v63_v19  ;;  %v1313_v31 = vand.u32 4294901760, %v27_v24  ;;  %v75_v34 = vand.u32 4294901760, %v1307_v28  ;;  %v78_v35 = vand.u32 4294901760, %v1309_v29  ;;  %v1348_v45 = vld [vmem:[#allocation2 + $0x78] sm:$0xff] }
  0x1a   :  { %1023 = vmatprep.subr.bf16.mxu1 %v1236_v0  ;;  %1095 = vmatprep.subr.bf16.mxu0 %v1236_v0  ;;  %v1319_v33 = vpack.c.bf16 %v72_v27, %v69_v26  ;;  %v1329_v38 = vsub.f32 %v30_v4, %v51_v8  ;;  %v1331_v39 = vsub.f32 %v31_v7, %v54_v9  ;;  %v81_v40 = vand.u32 4294901760, %v1323_v36 }
  0x1b   :  { %v1335_v41 = vsub.f32 %v27_v24, %v1313_v31  ;;  %v1343_v42 = vpack.c.bf16 %v78_v35, %v75_v34  ;;  %v84_v43 = vand.u32 4294901760, %v1327_v37  ;;  %v138_v46 = vand.u32 4294901760, %v1311_v30 }
  0x1c   :  { %v145_v47 = vand.u32 4294901760, %v1315_v32  ;;  %v1354_v48 = vsub.f32 %v32_v10, %v57_v14  ;;  %v1356_v49 = vsub.f32 %v33_v11, %v60_v15  ;;  %v87_v50 = vand.u32 4294901760, %v1346_v44 }
  0x1d   :  { %1025 = vmatpush3.bf16.msra.mxu1 %v1279_v13  ;;  %1097 = vmatpush3.bf16.msra.mxu0 %v1279_v13  ;;  %v90_v51 = vand.u32 4294901760, %v1348_v45  ;;  %v127_v52 = vand.u32 4294901760, %v1335_v41  ;;  %v152_v53 = vand.u32 4294901760, %v1329_v38  ;;  %v1368_v54 = vpack.c.bf16 %v84_v43, %v81_v40 }
  0x1e   :  { %1026 = vmatprep.subr.bf16.mxu1 %v1236_v0  ;;  %1098 = vmatprep.subr.bf16.mxu0 %v1236_v0  ;;  %v139_v55 = vsub.f32 %v1311_v30, %v138_v46  ;;  %v146_v56 = vsub.f32 %v1315_v32, %v145_v47  ;;  %v159_v57 = vand.u32 4294901760, %v1331_v39  ;;  %v1375_v58 = vsub.f32 %v34_v16, %v63_v19 }
  0x1f   :  { %v1377_v59 = vsub.f32 %v35_v17, %v66_v20  ;;  %v128_v60 = vsub.f32 %v1335_v41, %v127_v52  ;;  %v153_v61 = vsub.f32 %v1329_v38, %v152_v53  ;;  %v166_v62 = vand.u32 4294901760, %v1354_v48 }
  0x20   :  { %v173_v63 = vand.u32 4294901760, %v1356_v49  ;;  %v1389_v2 = vpack.c.bf16 %v90_v51, %v87_v50  ;;  %v140_v3 = vand.u32 4294901760, %v139_v55  ;;  %v147_v4 = vand.u32 4294901760, %v146_v56 }
  0x21   :  { %1028 = vmatpush3.bf16.msra.mxu1 %v1285_v18  ;;  %1100 = vmatpush3.bf16.msra.mxu0 %v1285_v18  ;;  %v160_v5 = vsub.f32 %v1331_v39, %v159_v57  ;;  %v1395_v6 = vsub.f32 %v1294_v22, %v69_v26  ;;  %v1398_v7 = vsub.f32 %v1296_v23, %v72_v27  ;;  %v129_v9 = vand.u32 4294901760, %v128_v60 }
  0x22   :  { %1029 = vmatprep.subr.bf16.mxu1 %v1236_v0  ;;  %1101 = vmatprep.subr.bf16.mxu0 %v1236_v0  ;;  %v1117_v8 = vpack.c.bf16 %v145_v47, %v138_v46  ;;  %v154_v10 = vand.u32 4294901760, %v153_v61  ;;  %v167_v11 = vsub.f32 %v1354_v48, %v166_v62  ;;  %v174_v14 = vsub.f32 %v1356_v49, %v173_v63 }
  0x23   :  { %v1045_v15 = vpack.c.bf16 %v147_v4, %v140_v3  ;;  %v161_v16 = vand.u32 4294901760, %v160_v5  ;;  %v180_v17 = vand.u32 4294901760, %v1375_v58  ;;  %v187_v19 = vand.u32 4294901760, %v1377_v59 }
  0x24   :  { %v1411_v20 = vsub.f32 %v1307_v28, %v75_v34  ;;  %v1416_v22 = vsub.f32 %v1309_v29, %v78_v35  ;;  %v1120_v23 = vpack.c.bf16 %v159_v57, %v152_v53  ;;  %v168_v24 = vand.u32 4294901760, %v167_v11 }
  0x25   :  { %1031 = vmatpush3.bf16.msra.mxu1 %v1301_v25  ;;  %1103 = vmatpush3.bf16.msra.mxu0 %v1301_v25  ;;  %v175_v26 = vand.u32 4294901760, %v174_v14  ;;  %v194_v27 = vand.u32 4294901760, %v1395_v6  ;;  %v1048_v46 = vpack.c.bf16 %v161_v16, %v154_v10  ;;  %v181_v47 = vsub.f32 %v1375_v58, %v180_v17 }
  0x26   :  { %1032 = vmatprep.subr.bf16.mxu1 %v1236_v0  ;;  %1104 = vmatprep.subr.bf16.mxu0 %v1236_v0  ;;  %v188_v28 = vsub.f32 %v1377_v59, %v187_v19  ;;  %v201_v34 = vand.u32 4294901760, %v1398_v7  ;;  %v1427_v29 = vsub.f32 %v1323_v36, %v81_v40  ;;  %v1432_v35 = vsub.f32 %v1327_v37, %v84_v43 }
  0x27   :  { %v1123_v53 = vpack.c.bf16 %v173_v63, %v166_v62  ;;  %v195_v55 = vsub.f32 %v1395_v6, %v194_v27  ;;  %v208_v56 = vand.u32 4294901760, %v1411_v20  ;;  %v182_v36 = vand.u32 4294901760, %v181_v47 }
  0x28   :  { %v189_v40 = vand.u32 4294901760, %v188_v28  ;;  %v202_v57 = vsub.f32 %v1398_v7, %v201_v34  ;;  %v215_v37 = vand.u32 4294901760, %v1416_v22  ;;  %v1447_v43 = vsub.f32 %v1346_v44, %v87_v50 }
  0x29   :  { %1034 = vmatpush3.bf16.msra.mxu1 %v1319_v33  ;;  %1106 = vmatpush3.bf16.msra.mxu0 %v1319_v33  ;;  %v1452_v60 = vsub.f32 %v1348_v45, %v90_v51  ;;  %v1126_v61 = vpack.c.bf16 %v187_v19, %v180_v17  ;;  %v196_v62 = vand.u32 4294901760, %v195_v55  ;;  %v209_v63 = vsub.f32 %v1411_v20, %v208_v56 }
  0x2a   :  { %1035 = vmatprep.subr.bf16.mxu1 %v1236_v0  ;;  %1107 = vmatprep.subr.bf16.mxu0 %v1236_v0  ;;  %v222_v3 = vand.u32 4294901760, %v1427_v29  ;;  %v1054_v4 = vpack.c.bf16 %v189_v40, %v182_v36  ;;  %v203_v5 = vand.u32 4294901760, %v202_v57  ;;  %v229_v44 = vand.u32 4294901760, %v1432_v35 }
  0x2b   :  { %v1129_v45 = vpack.c.bf16 %v201_v34, %v194_v27  ;;  %v210_v50 = vand.u32 4294901760, %v209_v63  ;;  %v1132_v16 = vpack.c.bf16 %v215_v37, %v208_v56  ;;  %v1072_v55 = vpack.c.bf16 %v1331_v39, %v1329_v38 }
  0x2c   :  { %v223_v51 = vsub.f32 %v1427_v29, %v222_v3  ;;  %v1057_v10 = vpack.c.bf16 %v203_v5, %v196_v62  ;;  %v230_v14 = vsub.f32 %v1432_v35, %v229_v44 }
  0x2d   :  { %1037 = vmatpush3.bf16.msra.mxu1 %v1343_v42  ;;  %1109 = vmatpush3.bf16.msra.mxu0 %v1343_v42 }
  0x2e   :  { %1038 = vmatprep.subr.bf16.mxu1 %v1236_v0  ;;  %1110 = vmatprep.subr.bf16.mxu0 %v1236_v0  ;;  %v224_v17 = vand.u32 4294901760, %v223_v51 }
  0x31   :  { %1040 = vmatpush3.bf16.msra.mxu1 %v1368_v54  ;;  %1112 = vmatpush3.bf16.msra.mxu0 %v1368_v54 }
  0x32   :  { %1041 = vmatprep.subr.bf16.mxu1 %v1236_v0  ;;  %1113 = vmatprep.subr.bf16.mxu0 %v1236_v0 }
  0x35   :  { %1043 = vmatpush3.bf16.msra.mxu1 %v1389_v2  ;;  %1115 = vmatpush3.bf16.msra.mxu0 %v1389_v2 }
  0x36   :  { %1044 = vmatprep.subr.bf16.mxu1 %v1236_v0  ;;  %1116 = vmatprep.subr.bf16.mxu0 %v1236_v0 }
  0x38   :  { %843 = vmatmul.mubr.f32.vlgmr.msra.gmra.mrb[0].mxu1 %v129_v9  ;;  %948 = vmatmul.mubr.f32.vlgmr.msra.gmra.mrb[0].mxu0 %v127_v52  ;;  %v1051_v52 = vpack.c.bf16 %v175_v26, %v168_v24  ;;  %v236_v9 = vand.u32 4294901760, %v1447_v43 }
  0x39   :  { %1046 = vmatpush3.bf16.msra.mxu1 %v1045_v15  ;;  %1118 = vmatpush3.bf16.msra.mxu0 %v1117_v8  ;;  %v216_v8 = vsub.f32 %v1416_v22, %v215_v37  ;;  %v243_v15 = vand.u32 4294901760, %v1452_v60 }
  0x3a   :  { %1047 = vmatprep.subr.bf16.mxu1 %v1236_v0  ;;  %1119 = vmatprep.subr.bf16.mxu0 %v1236_v0  ;;  %v237_v24 = vsub.f32 %v1447_v43, %v236_v9 }
  0x3b   :  { %877 = vmatprep.mubr.msk.f32.mxu1 %vm1237_vm0, %v1238_v1  ;;  %982 = vmatprep.mubr.msk.f32.mxu0 %vm1237_vm0, %v1238_v1  ;;  %v217_v11 = vand.u32 4294901760, %v216_v8  ;;  %v244_v26 = vsub.f32 %v1452_v60, %v243_v15 }
  0x3c   :  { %v238_v47 = vand.u32 4294901760, %v237_v24 }
  0x3d   :  { %1049 = vmatpush3.bf16.msra.mxu1 %v1048_v46  ;;  %1121 = vmatpush3.bf16.msra.mxu0 %v1120_v23  ;;  %v1060_v19 = vpack.c.bf16 %v217_v11, %v210_v50  ;;  %v231_v23 = vand.u32 4294901760, %v230_v14  ;;  %v1135_v46 = vpack.c.bf16 %v229_v44, %v222_v3  ;;  %v245_v28 = vand.u32 4294901760, %v244_v26 }
  0x3e   :  { %1050 = vmatprep.subr.bf16.mxu1 %v1236_v0  ;;  %1122 = vmatprep.subr.bf16.mxu0 %v1236_v0 }
  0x3f   :  { %v1063_v27 = vpack.c.bf16 %v231_v23, %v224_v17  ;;  %v1066_v34 = vpack.c.bf16 %v245_v28, %v238_v47 }
  0x41   :  { %1052 = vmatpush3.bf16.msra.mxu1 %v1051_v52  ;;  %1124 = vmatpush3.bf16.msra.mxu0 %v1123_v53  ;;  %v1138_v52 = vpack.c.bf16 %v243_v15, %v236_v9  ;;  %v1069_v53 = vpack.c.bf16 %v1315_v32, %v1311_v30  ;;  %v1075_v30 = vpack.c.bf16 %v1356_v49, %v1354_v48 }
  0x42   :  { %1053 = vmatprep.subr.bf16.mxu1 %v1236_v0  ;;  %1125 = vmatprep.subr.bf16.mxu0 %v1236_v0 }
  0x45   :  { %1055 = vmatpush3.bf16.msra.mxu1 %v1054_v4  ;;  %1127 = vmatpush3.bf16.msra.mxu0 %v1126_v61 }
  0x46   :  { %1056 = vmatprep.subr.bf16.mxu1 %v1236_v0  ;;  %1128 = vmatprep.subr.bf16.mxu0 %v1236_v0 }
  0x49   :  { %1058 = vmatpush3.bf16.msra.mxu1 %v1057_v10  ;;  %1130 = vmatpush3.bf16.msra.mxu0 %v1129_v45 }
  0x4a   :  { %1059 = vmatprep.subr.bf16.mxu1 %v1236_v0  ;;  %1131 = vmatprep.subr.bf16.mxu0 %v1236_v0 }
  0x4d   :  { %1061 = vmatpush3.bf16.msra.mxu1 %v1060_v19  ;;  %1133 = vmatpush3.bf16.msra.mxu0 %v1132_v16 }
  0x4e   :  { %1062 = vmatprep.subr.bf16.mxu1 %v1236_v0  ;;  %1134 = vmatprep.subr.bf16.mxu0 %v1236_v0 }
  0x51   :  { %1064 = vmatpush3.bf16.msra.mxu1 %v1063_v27  ;;  %1136 = vmatpush3.bf16.msra.mxu0 %v1135_v46 }
  0x52   :  { %1065 = vmatprep.subr.bf16.mxu1 %v1236_v0  ;;  %1137 = vmatprep.subr.bf16.mxu0 %v1236_v0 }
  0x55   :  { %1067 = vmatpush3.bf16.msra.mxu1 %v1066_v34  ;;  %1139 = vmatpush3.bf16.msra.mxu0 %v1138_v52 }
  0x56   :  { %1068 = vmatprep.subr.bf16.mxu1 %v1236_v0  ;;  %1140 = vmatprep.subr.bf16.mxu0 %v1236_v0 }
  0x58   :  { %878 = vmatmul.mubr.f32.vlgmr.msra.gmra.mrb[0].mxu1 %v1313_v31  ;;  %983 = vmatmul.mubr.f32.vlgmr.msra.gmra.mrb[0].mxu0 %v1313_v31 }
  0x59   :  { %1070 = vmatpush3.bf16.msra.mxu1 %v1069_v53  ;;  %1142 = vmatpush3.bf16.msra.mxu0 %v1275_v12  ;;  %v1078_v12 = vpack.c.bf16 %v1377_v59, %v1375_v58 }
  0x5a   :  { %1071 = vmatprep.subr.bf16.mxu1 %v1236_v0  ;;  %1143 = vmatprep.subr.bf16.mxu0 %v1236_v0 }
  0x5b   :  { %912 = vmatprep.mubr.msk.f32.mxu1 %vm1237_vm0, %v1238_v1  ;;  %1017 = vmatprep.mubr.msk.f32.mxu0 %vm1237_vm0, %v1238_v1  ;;  %v1081_v1 = vpack.c.bf16 %v1398_v7, %v1395_v6 }
  0x5d   :  { %1073 = vmatpush3.bf16.msra.mxu1 %v1072_v55  ;;  %1145 = vmatpush3.bf16.msra.mxu0 %v1279_v13  ;;  %v1084_v13 = vpack.c.bf16 %v1416_v22, %v1411_v20 }
  0x5e   :  { %1074 = vmatprep.subr.bf16.mxu1 %v1236_v0  ;;  %1146 = vmatprep.subr.bf16.mxu0 %v1236_v0 }
  0x61   :  { %1076 = vmatpush3.bf16.msra.mxu1 %v1075_v30  ;;  %1148 = vmatpush3.bf16.msra.mxu0 %v1285_v18  ;;  %v1087_v18 = vpack.c.bf16 %v1432_v35, %v1427_v29 }
  0x62   :  { %1077 = vmatprep.subr.bf16.mxu1 %v1236_v0  ;;  %1149 = vmatprep.subr.bf16.mxu0 %v1236_v0 }
  0x65   :  { %1079 = vmatpush3.bf16.msra.mxu1 %v1078_v12  ;;  %1151 = vmatpush3.bf16.msra.mxu0 %v1301_v25  ;;  %v1090_v25 = vpack.c.bf16 %v1452_v60, %v1447_v43 }
  0x66   :  { %1080 = vmatprep.subr.bf16.mxu1 %v1236_v0  ;;  %1152 = vmatprep.subr.bf16.mxu0 %v1236_v0 }
  0x69   :  { %1082 = vmatpush3.bf16.msra.mxu1 %v1081_v1  ;;  %1154 = vmatpush3.bf16.msra.mxu0 %v1319_v33 }
  0x6a   :  { %1083 = vmatprep.subr.bf16.mxu1 %v1236_v0  ;;  %1155 = vmatprep.subr.bf16.mxu0 %v1236_v0 }
  0x6d   :  { %1085 = vmatpush3.bf16.msra.mxu1 %v1084_v13  ;;  %1157 = vmatpush3.bf16.msra.mxu0 %v1343_v42 }
  0x6e   :  { %1086 = vmatprep.subr.bf16.mxu1 %v1236_v0  ;;  %1158 = vmatprep.subr.bf16.mxu0 %v1236_v0 }
  0x71   :  { %1088 = vmatpush3.bf16.msra.mxu1 %v1087_v18  ;;  %1160 = vmatpush3.bf16.msra.mxu0 %v1368_v54 }
  0x72   :  { %1089 = vmatprep.subr.bf16.mxu1 %v1236_v0  ;;  %1161 = vmatprep.subr.bf16.mxu0 %v1236_v0 }
  0x75   :  { %1091 = vmatpush3.bf16.msra.mxu1 %v1090_v25  ;;  %1163 = vmatpush3.bf16.msra.mxu0 %v1389_v2 }
  0x78   :  { %913 = vmatmul.mubr.f32.vlgmr.msra.gmra.mrb[0].mxu1 %v1335_v41  ;;  %1018 = vmatmul.mubr.f32.vlgmr.msra.gmra.mrb[0].mxu0 %v1313_v31 }
 0x14b   :  { %v386_v32 = vpop.f32.mrb[0].mxu1  ;;  %v681_v33 = vpop.f32.mrb[0].mxu0 }
 0x14c   :  { %v1164_v38 = vadd.f32 1e-10, %v386_v32  ;;  %v914_v39 = vpop.f32.mrb[1].mxu1  ;;  %v1019_v42 = vpop.f32.mrb[1].mxu0 }
 0x14e   :  { %v1165_v48 = vadd.f32 %v1164_v38, %v681_v33 }
 0x150   :  { %1183 = vrcp.f32 %v1165_v48 }
 0x15a   :  { %v1184_v49 = vpop.eup %1183 }
 0x15b   :  { %v686_v54 = vmul.f32 %v1184_v49, %v1165_v48 }
 0x15d   :  { %v687_v58 = vsub.f32 2.0, %v686_v54 }
 0x15f   :  { %v688_v59 = vmul.f32 %v1184_v49, %v687_v58 }
 0x161   :  { %v689_v0 = vmul.f32 %v688_v59, %v1290_v21 }
 0x163   :  { %690 = vst [vmem:[#allocation5] sm:$0xff] %v689_v0 }
 0x164   :  { %695 = vsyncadd [#allocation4], 96  ;;  %s1239_s1 = smov [#allocation5]  }
 0x165   :  { %s696_s24 = sshll.u32 %s1239_s1, 4  ;;  %s697_s24 = int_to_ptr.vmem [resolvable:$true] %s696_s24 }
 0x166   :  { %s1207_s25 = scalar_lea.vmem %s697_s24, 32  ;;  %s1211_s26 = scalar_lea.vmem %s697_s24, 128 }
 0x167   :  { %p1208_p8 = scmp.ne.s32.totalorder %s697_s24, %s1207_s25  ;;  %p1212_p9 = scmp.lt.s32.totalorder %s697_s24, %s697_s24 }
 0x168   :  { %p1213_p10 = scmp.lt.s32.totalorder %s1211_s26, %s1207_s25 }
 0x16a   :  { %p1214_p11 = por %p1213_p10, %p1212_p9 }
 0x16c   :  { %p1215_p12 = pnand %p1214_p11, %p1208_p8 }
 0x16e   :  { %1218 = shalt.err (!%p1215_p12)
}
 0x16f   :  { %s1219_s29 = scalar_lea.hbm %s1537_s2, 32 }
 0x170   :  { %p1220_p13 = scmp.ne.s32.totalorder %s1537_s2, %s1219_s29  ;;  %p1223_p0 = scmp.lt.u32.totalorder %s1219_s29, %s1537_s2 }
 0x172   :  { %p1225_p1 = pnand %p1223_p0, %p1220_p13 }
 0x174   :  { %1228 = shalt.err (!%p1225_p1)
}
 0x175   :  { %s1240_s6 = smov 32   ;;  %s1241_s7 = smov 2  }
 0x176   :  { %702 = dma.vmem_to_hbm [thread:$0]  %s697_s24, 32, %s1537_s2, [#allocation4], %s1240_s6, %s1240_s6, %s1241_s7  }
 0x177   :  { %1231 = dma.done.wait [#allocation4], 128  }
 0x178   :  { %1232 = vsyncadd [#allocation4], 4294967168 }
 0x179   :  { %706 = vsyncpa [#allocation3], 1 }
 0x17a   :  { %707 = vsyncpa [#allocation4], 1 }

</bundles_post_ra>
